<compile_context>
chip_gen: v5e
topology: v5e:2x2
jax: 0.10.0
libtpu: 0.0.40
codegen_flags: <defaults>
</compile_context>

<pallas_src>
import jax
import jax.numpy as jnp
from jax.experimental import pallas as pl
from jax.experimental.pallas import tpu as pltpu


K_IN, H_DIM, O_DIM = 24 * 24, 100, 10   # logical (PyTorch) shapes


# ---------------------------------------------------------------------------
# Kernel: fused  sigmoid(x @ W1 + b1) @ W2 + b2  on one batch tile.
# ---------------------------------------------------------------------------
def mnist_mlp_kernel(x_ref, w1_ref, b1_ref, w2_ref, b2_ref, out_ref):
    # fc1: [TB, 576] @ [576, 100]  (Mosaic lane-pads 576/100 internally)
    h = jnp.dot(x_ref[...], w1_ref[...], preferred_element_type=jnp.float32)
    h = h + b1_ref[...]                       # (1, 100) bias, per-vreg bcast
    # sigmoid(h) == 0.5 * (tanh(h/2) + 1): stays on the EUP slot.
    h = 0.5 * (jnp.tanh(0.5 * h) + 1.0)
    # fc2: [TB, 100] @ [100, 10]
    h = h.astype(w2_ref.dtype)                # bf16 path feeds MXU at bf16
    o = jnp.dot(h, w2_ref[...], preferred_element_type=jnp.float32)
    out_ref[...] = (o + b2_ref[...]).astype(out_ref.dtype)


# ---------------------------------------------------------------------------
# Wrapper
# ---------------------------------------------------------------------------
def mnist_net_forward(x, w1, b1, w2, b2, *, tb=2048, compute_dtype=jnp.float32):
    """Fused forward: sigmoid(x @ w1 + b1) @ w2 + b2.

    x:  [B, 576]       w1: [576, 100]   b1: [100] (or [1, 100])
                       w2: [100, 10]    b2: [10]  (or [1, 10])
    returns [B, 10] float32
    """
    B, K = x.shape
    assert K == K_IN and w1.shape == (K_IN, H_DIM) and w2.shape == (H_DIM, O_DIM)

    # Cast the matmul operands (x, w1, w2) to the compute dtype; biases and
    # accumulation stay f32.  compute_dtype=bf16 halves HBM traffic and runs
    # the MXU at full rate on v5e/v7x.
    xc = x.astype(compute_dtype)
    w1c = w1.astype(compute_dtype)
    w2c = w2.astype(compute_dtype)
    b1c = jnp.asarray(b1, jnp.float32).reshape(1, H_DIM)
    b2c = jnp.asarray(b2, jnp.float32).reshape(1, O_DIM)

    # Batch tile: multiple of 8, at most tb; tail block is masked by Pallas.
    tb = max(8, (int(tb) // 8) * 8)
    TB = min(tb, pl.cdiv(B, 8) * 8)
    grid = (pl.cdiv(B, TB),)

    itemsize = jnp.dtype(compute_dtype).itemsize
    cost = pl.CostEstimate(
        flops=2 * B * (K_IN * H_DIM + H_DIM * O_DIM),
        transcendentals=B * H_DIM,
        bytes_accessed=(B * K_IN * itemsize                       # x read
                        + (K_IN * H_DIM + H_DIM * O_DIM) * itemsize  # weights
                        + (H_DIM + O_DIM) * 4                     # biases
                        + B * O_DIM * 4),                         # output
    )

    return pl.pallas_call(
        mnist_mlp_kernel,
        out_shape=jax.ShapeDtypeStruct((B, O_DIM), jnp.float32),
        grid_spec=pl.GridSpec(
            grid=grid,
            in_specs=[
                # x: tiled over batch only, double-buffered DMA overlaps MXU.
                pl.BlockSpec((TB, K_IN), lambda i: (i, 0)),
                # weights/biases: constant index_map -> stay VMEM-resident.
                pl.BlockSpec((K_IN, H_DIM), lambda i: (0, 0)),
                pl.BlockSpec((1, H_DIM), lambda i: (0, 0)),
                pl.BlockSpec((H_DIM, O_DIM), lambda i: (0, 0)),
                pl.BlockSpec((1, O_DIM), lambda i: (0, 0)),
            ],
            out_specs=pl.BlockSpec((TB, O_DIM), lambda i: (i, 0)),
        ),
        compiler_params=pltpu.CompilerParams(
            # Independent batch tiles -> shard across TensorCores on v7x.
            dimension_semantics=("parallel",),
            # TB=2048 needs ~13 MB (f32) of double-buffered VMEM: raise the
            # scoped limit past v5e's 16 MiB default, stay <= v7x's 64 MiB.
            vmem_limit_bytes=48 * 1024 * 1024,
        ),
        cost_estimate=cost,
    )(xc, w1c, b1c, w2c, b2c)


# ---------------------------------------------------------------------------
# Params (nn.Linear-style init, stored as [in, out] = PyTorch weight.T)
# ---------------------------------------------------------------------------
def init_params(key):
    k1, k2, k3, k4 = jax.random.split(key, 4)
    bound1 = 1.0 / jnp.sqrt(K_IN)
    bound2 = 1.0 / jnp.sqrt(H_DIM)
    w1 = jax.random.uniform(k1, (K_IN, H_DIM), jnp.float32, -bound1, bound1)
    b1 = jax.random.uniform(k2, (H_DIM,), jnp.float32, -bound1, bound1)
    w2 = jax.random.uniform(k3, (H_DIM, O_DIM), jnp.float32, -bound2, bound2)
    b2 = jax.random.uniform(k4, (O_DIM,), jnp.float32, -bound2, bound2)
    return w1, b1, w2, b2


if __name__ == "__main__":
    key = jax.random.PRNGKey(0)
    kx, kp = jax.random.split(key)
    w1, b1, w2, b2 = init_params(kp)

    ok = True
    # f32 path; B=5 exercises the masked batch-tail block (TB=8 > B).
    for B in (8, 5):
        x = jax.random.normal(jax.random.fold_in(kx, B), (B, K_IN), jnp.float32)
        out = jax.block_until_ready(mnist_net_forward(x, w1, b1, w2, b2))
        ref = jax.nn.sigmoid(x @ w1 + b1) @ w2 + b2
        ok &= out.shape == (B, O_DIM)
        ok &= bool(jnp.allclose(out, ref, atol=1e-5, rtol=1e-5))

    # bf16 compute path (halved HBM traffic / full MXU rate on v5e & v7x).
    B = 16
    x = jax.random.normal(jax.random.fold_in(kx, B), (B, K_IN), jnp.float32)
    out = jax.block_until_ready(
        mnist_net_forward(x, w1, b1, w2, b2, compute_dtype=jnp.bfloat16))
    ref = jax.nn.sigmoid(x @ w1 + b1) @ w2 + b2
    ok &= out.shape == (B, O_DIM)
    ok &= bool(jnp.allclose(out, ref, atol=2e-2, rtol=2e-2))

    assert ok
    print("KERNEL_OK")
</pallas_src>

<mosaic_0001>
module attributes {stable_mosaic.version = 11 : i64} {
  func.func @mnist_mlp_kernel(%arg0: i32, %arg1: memref<8x576xf32, #tpu.memory_space<vmem>>, %arg2: memref<576x100xf32, #tpu.memory_space<vmem>>, %arg3: memref<1x100xf32, #tpu.memory_space<vmem>>, %arg4: memref<100x10xf32, #tpu.memory_space<vmem>>, %arg5: memref<1x10xf32, #tpu.memory_space<vmem>>, %arg6: memref<8x10xf32, #tpu.memory_space<vmem>>) attributes {dimension_semantics = [#tpu.dimension_semantics<parallel>], iteration_bounds = array<i64: 1>, scalar_prefetch = 0 : i64, scratch_operands = 0 : i64, tpu.core_type = #tpu.core_type<tc>, window_params = [{transform_indices = @transform_0, window_bounds = array<i64: 8, 576>}, {pipeline_mode = #tpu.pipeline_mode<synchronous>, transform_indices = @transform_1, window_bounds = array<i64: 576, 100>}, {pipeline_mode = #tpu.pipeline_mode<synchronous>, transform_indices = @transform_2, window_bounds = array<i64: 1, 100>}, {pipeline_mode = #tpu.pipeline_mode<synchronous>, transform_indices = @transform_3, window_bounds = array<i64: 100, 10>}, {pipeline_mode = #tpu.pipeline_mode<synchronous>, transform_indices = @transform_4, window_bounds = array<i64: 1, 10>}, {transform_indices = @transform_5, window_bounds = array<i64: 8, 10>}]} {
    %c0 = arith.constant 0 : index
    %c0_0 = arith.constant 0 : index
    %0 = vector.load %arg1[%c0, %c0_0] : memref<8x576xf32, #tpu.memory_space<vmem>>, vector<8x576xf32>
    %c0_1 = arith.constant 0 : index
    %c0_2 = arith.constant 0 : index
    %1 = vector.load %arg2[%c0_1, %c0_2] : memref<576x100xf32, #tpu.memory_space<vmem>>, vector<576x100xf32>
    %cst = arith.constant dense<0.000000e+00> : vector<8x100xf32>
    %2 = tpu.matmul %0, %1, %cst {dimension_numbers = #tpu.dot_dimension_numbers<[1], [0], [0], [1], [0, 0, 1, 1], [], []>} : vector<8x576xf32>, vector<576x100xf32>, vector<8x100xf32> -> vector<8x100xf32>
    %c0_3 = arith.constant 0 : index
    %c0_4 = arith.constant 0 : index
    %3 = vector.load %arg3[%c0_3, %c0_4] : memref<1x100xf32, #tpu.memory_space<vmem>>, vector<1x100xf32>
    %4 = vector.broadcast %3 : vector<1x100xf32> to vector<8x100xf32>
    %5 = arith.addf %2, %4 : vector<8x100xf32>
    %cst_5 = arith.constant 5.000000e-01 : f32
    %6 = vector.broadcast %cst_5 : f32 to vector<8x100xf32>
    %7 = arith.mulf %6, %5 : vector<8x100xf32>
    %8 = math.tanh %7 : vector<8x100xf32>
    %cst_6 = arith.constant 1.000000e+00 : f32
    %9 = vector.broadcast %cst_6 : f32 to vector<8x100xf32>
    %10 = arith.addf %8, %9 : vector<8x100xf32>
    %cst_7 = arith.constant 5.000000e-01 : f32
    %11 = vector.broadcast %cst_7 : f32 to vector<8x100xf32>
    %12 = arith.mulf %11, %10 : vector<8x100xf32>
    %c0_8 = arith.constant 0 : index
    %c0_9 = arith.constant 0 : index
    %13 = vector.load %arg4[%c0_8, %c0_9] : memref<100x10xf32, #tpu.memory_space<vmem>>, vector<100x10xf32>
    %cst_10 = arith.constant dense<0.000000e+00> : vector<8x10xf32>
    %14 = tpu.matmul %12, %13, %cst_10 {dimension_numbers = #tpu.dot_dimension_numbers<[1], [0], [0], [1], [0, 0, 1, 1], [], []>} : vector<8x100xf32>, vector<100x10xf32>, vector<8x10xf32> -> vector<8x10xf32>
    %c0_11 = arith.constant 0 : index
    %c0_12 = arith.constant 0 : index
    %15 = vector.load %arg5[%c0_11, %c0_12] : memref<1x10xf32, #tpu.memory_space<vmem>>, vector<1x10xf32>
    %16 = vector.broadcast %15 : vector<1x10xf32> to vector<8x10xf32>
    %17 = arith.addf %14, %16 : vector<8x10xf32>
    %c0_13 = arith.constant 0 : index
    %c0_14 = arith.constant 0 : index
    %18 = vector.load %arg6[%c0_13, %c0_14] : memref<8x10xf32, #tpu.memory_space<vmem>>, vector<8x10xf32>
    tpu.vector_store %arg6[%c0_13, %c0_14], %17 {strides = array<i32>} : memref<8x10xf32, #tpu.memory_space<vmem>>, vector<8x10xf32>,
    return
  }
  func.func @transform_0(%arg0: i32) -> (i32, i32) {
    %c0_i32 = arith.constant 0 : i32
    %c0_i32_0 = arith.constant 0 : i32
    return %arg0, %c0_i32 : i32, i32
  }
  func.func @transform_1(%arg0: i32) -> (i32, i32) {
    %c0_i32 = arith.constant 0 : i32
    %c0_i32_0 = arith.constant 0 : i32
    %c0_i32_1 = arith.constant 0 : i32
    return %c0_i32, %c0_i32_0 : i32, i32
  }
  func.func @transform_2(%arg0: i32) -> (i32, i32) {
    %c0_i32 = arith.constant 0 : i32
    %c0_i32_0 = arith.constant 0 : i32
    %c0_i32_1 = arith.constant 0 : i32
    return %c0_i32, %c0_i32_0 : i32, i32
  }
  func.func @transform_3(%arg0: i32) -> (i32, i32) {
    %c0_i32 = arith.constant 0 : i32
    %c0_i32_0 = arith.constant 0 : i32
    %c0_i32_1 = arith.constant 0 : i32
    return %c0_i32, %c0_i32_0 : i32, i32
  }
  func.func @transform_4(%arg0: i32) -> (i32, i32) {
    %c0_i32 = arith.constant 0 : i32
    %c0_i32_0 = arith.constant 0 : i32
    %c0_i32_1 = arith.constant 0 : i32
    return %c0_i32, %c0_i32_0 : i32, i32
  }
  func.func @transform_5(%arg0: i32) -> (i32, i32) {
    %c0_i32 = arith.constant 0 : i32
    %c0_i32_0 = arith.constant 0 : i32
    return %arg0, %c0_i32 : i32, i32
  }
}

</mosaic_0001>

<bundles_post_ra>
// kernel: tpu_custom_call.1
= control target key start
LH: loop header
LB: loop body
LE: loop exit
PB: predicated region body
PF: predicated region fallthrough
CT: control target
= control target key end

     0   :  { %s617_s0 = inlined_call_operand.vmem [shape: f32[8,576], index: 0, kind: input, shape index: {}]   ;;  %s618_s1 = inlined_call_operand.vmem [shape: f32[576,100], index: 1, kind: input, shape index: {}]   ;;  %s619_s2 = inlined_call_operand.vmem [shape: f32[1,100], index: 2, kind: input, shape index: {}]   ;;  %s620_s3 = inlined_call_operand.vmem [shape: f32[100,10], index: 3, kind: input, shape index: {}]   ;;  %s621_s4 = inlined_call_operand.vmem [shape: f32[1,10], index: 4, kind: input, shape index: {}]   ;;  %s622_s5 = inlined_call_operand.hbm [shape: f32[8,10], index: 5, kind: output, shape index: {}]  }
   0x1   :  { %v41_v0 = vld [vmem:[%s618_s1 + $0x78] sm:$0xff]  ;;  %v40_v1 = vld [vmem:[%s618_s1 + $0x70] sm:$0xff]  ;;  %v39_v4 = vld [vmem:[%s618_s1 + $0x68] sm:$0xff] }
   0x2   :  { %106 = vmatpush.msra.mxu0 %v41_v0  ;;  %v73_v2 = vld [vmem:[%s618_s1 + $0x178] sm:$0xff]  ;;  %v72_v3 = vld [vmem:[%s618_s1 + $0x170] sm:$0xff]  ;;  %v71_v7 = vld [vmem:[%s618_s1 + $0x168] sm:$0xff] }
   0x3   :  { %146 = vmatpush.msra.mxu2 %v73_v2  ;;  %v89_v5 = vld [vmem:[%s618_s1 + $0x1f8] sm:$0xff]  ;;  %v88_v8 = vld [vmem:[%s618_s1 + $0x1f0] sm:$0xff]  ;;  %v38_v9 = vld [vmem:[%s618_s1 + $0x60] sm:$0xff] }
   0x4   :  { %v57_v6 = vld [vmem:[%s618_s1 + $0xf8] sm:$0xff]  ;;  %107 = vmatpush.msra.mxu0 %v40_v1  ;;  %166 = vmatpush.msra.mxu3 %v89_v5  ;;  %v56_v10 = vld [vmem:[%s618_s1 + $0xf0] sm:$0xff]  ;;  %v87_v11 = vld [vmem:[%s618_s1 + $0x1e8] sm:$0xff] }
   0x5   :  { %147 = vmatpush.msra.mxu2 %v72_v3  ;;  %126 = vmatpush.msra.mxu1 %v57_v6  ;;  %v70_v12 = vld [vmem:[%s618_s1 + $0x160] sm:$0xff]  ;;  %v55_v13 = vld [vmem:[%s618_s1 + $0xe8] sm:$0xff]  ;;  %v37_v14 = vld [vmem:[%s618_s1 + $0x58] sm:$0xff] }
   0x6   :  { %108 = vmatpush.msra.mxu0 %v39_v4  ;;  %167 = vmatpush.msra.mxu3 %v88_v8  ;;  %v86_v15 = vld [vmem:[%s618_s1 + $0x1e0] sm:$0xff]  ;;  %v69_v16 = vld [vmem:[%s618_s1 + $0x158] sm:$0xff]  ;;  %v36_v18 = vld [vmem:[%s618_s1 + $0x50] sm:$0xff] }
   0x7   :  { %148 = vmatpush.msra.mxu2 %v71_v7  ;;  %127 = vmatpush.msra.mxu1 %v56_v10  ;;  %v54_v17 = vld [vmem:[%s618_s1 + $0xe0] sm:$0xff]  ;;  %v85_v19 = vld [vmem:[%s618_s1 + $0x1d8] sm:$0xff]  ;;  %v68_v20 = vld [vmem:[%s618_s1 + $0x150] sm:$0xff] }
   0x8   :  { %109 = vmatpush.msra.mxu0 %v38_v9  ;;  %168 = vmatpush.msra.mxu3 %v87_v11  ;;  %v53_v21 = vld [vmem:[%s618_s1 + $0xd8] sm:$0xff]  ;;  %v35_v22 = vld [vmem:[%s618_s1 + $0x48] sm:$0xff]  ;;  %v84_v23 = vld [vmem:[%s618_s1 + $0x1d0] sm:$0xff] }
   0x9   :  { %149 = vmatpush.msra.mxu2 %v70_v12  ;;  %128 = vmatpush.msra.mxu1 %v55_v13  ;;  %v67_v24 = vld [vmem:[%s618_s1 + $0x148] sm:$0xff]  ;;  %v52_v25 = vld [vmem:[%s618_s1 + $0xd0] sm:$0xff]  ;;  %v34_v26 = vld [vmem:[%s618_s1 + $0x40] sm:$0xff] }
   0xa   :  { %110 = vmatpush.msra.mxu0 %v37_v14  ;;  %169 = vmatpush.msra.mxu3 %v86_v15  ;;  %v83_v27 = vld [vmem:[%s618_s1 + $0x1c8] sm:$0xff]  ;;  %v66_v28 = vld [vmem:[%s618_s1 + $0x140] sm:$0xff]  ;;  %v33_v30 = vld [vmem:[%s618_s1 + $0x38] sm:$0xff] }
   0xb   :  { %150 = vmatpush.msra.mxu2 %v69_v16  ;;  %129 = vmatpush.msra.mxu1 %v54_v17  ;;  %v51_v29 = vld [vmem:[%s618_s1 + $0xc8] sm:$0xff]  ;;  %v82_v31 = vld [vmem:[%s618_s1 + $0x1c0] sm:$0xff]  ;;  %v65_v32 = vld [vmem:[%s618_s1 + $0x138] sm:$0xff] }
   0xc   :  { %111 = vmatpush.msra.mxu0 %v36_v18  ;;  %170 = vmatpush.msra.mxu3 %v85_v19  ;;  %v50_v33 = vld [vmem:[%s618_s1 + $0xc0] sm:$0xff]  ;;  %v32_v34 = vld [vmem:[%s618_s1 + $0x30] sm:$0xff]  ;;  %v81_v35 = vld [vmem:[%s618_s1 + $0x1b8] sm:$0xff] }
   0xd   :  { %151 = vmatpush.msra.mxu2 %v68_v20  ;;  %130 = vmatpush.msra.mxu1 %v53_v21  ;;  %v64_v36 = vld [vmem:[%s618_s1 + $0x130] sm:$0xff]  ;;  %v49_v37 = vld [vmem:[%s618_s1 + $0xb8] sm:$0xff]  ;;  %v31_v38 = vld [vmem:[%s618_s1 + $0x28] sm:$0xff] }
   0xe   :  { %112 = vmatpush.msra.mxu0 %v35_v22  ;;  %171 = vmatpush.msra.mxu3 %v84_v23  ;;  %v80_v39 = vld [vmem:[%s618_s1 + $0x1b0] sm:$0xff]  ;;  %v63_v40 = vld [vmem:[%s618_s1 + $0x128] sm:$0xff]  ;;  %v30_v42 = vld [vmem:[%s618_s1 + $0x20] sm:$0xff] }
   0xf   :  { %152 = vmatpush.msra.mxu2 %v67_v24  ;;  %131 = vmatpush.msra.mxu1 %v52_v25  ;;  %v48_v41 = vld [vmem:[%s618_s1 + $0xb0] sm:$0xff]  ;;  %v79_v43 = vld [vmem:[%s618_s1 + $0x1a8] sm:$0xff]  ;;  %v62_v44 = vld [vmem:[%s618_s1 + $0x120] sm:$0xff] }
  0x10   :  { %113 = vmatpush.msra.mxu0 %v34_v26  ;;  %172 = vmatpush.msra.mxu3 %v83_v27  ;;  %v47_v45 = vld [vmem:[%s618_s1 + $0xa8] sm:$0xff]  ;;  %v29_v46 = vld [vmem:[%s618_s1 + $0x18] sm:$0xff]  ;;  %v78_v47 = vld [vmem:[%s618_s1 + $0x1a0] sm:$0xff] }
  0x11   :  { %153 = vmatpush.msra.mxu2 %v66_v28  ;;  %132 = vmatpush.msra.mxu1 %v51_v29  ;;  %v61_v48 = vld [vmem:[%s618_s1 + $0x118] sm:$0xff]  ;;  %v46_v49 = vld [vmem:[%s618_s1 + $0xa0] sm:$0xff]  ;;  %v28_v50 = vld [vmem:[%s618_s1 + $0x10] sm:$0xff] }
  0x12   :  { %114 = vmatpush.msra.mxu0 %v33_v30  ;;  %173 = vmatpush.msra.mxu3 %v82_v31  ;;  %v77_v51 = vld [vmem:[%s618_s1 + $0x198] sm:$0xff]  ;;  %v27_v52 = vld [vmem:[%s618_s1 + $0x8] sm:$0xff]  ;;  %v60_v53 = vld [vmem:[%s618_s1 + $0x110] sm:$0xff] }
  0x13   :  { %154 = vmatpush.msra.mxu2 %v65_v32  ;;  %133 = vmatpush.msra.mxu1 %v50_v33  ;;  %v45_v54 = vld [vmem:[%s618_s1 + $0x98] sm:$0xff]  ;;  %v76_v55 = vld [vmem:[%s618_s1 + $0x190] sm:$0xff]  ;;  %v59_v56 = vld [vmem:[%s618_s1 + $0x108] sm:$0xff] }
  0x14   :  { %115 = vmatpush.msra.mxu0 %v32_v34  ;;  %174 = vmatpush.msra.mxu3 %v81_v35  ;;  %v44_v57 = vld [vmem:[%s618_s1 + $0x90] sm:$0xff] }
  0x15   :  { %155 = vmatpush.msra.mxu2 %v64_v36  ;;  %134 = vmatpush.msra.mxu1 %v49_v37 }
  0x16   :  { %116 = vmatpush.msra.mxu0 %v31_v38  ;;  %175 = vmatpush.msra.mxu3 %v80_v39 }
  0x17   :  { %156 = vmatpush.msra.mxu2 %v63_v40  ;;  %135 = vmatpush.msra.mxu1 %v48_v41 }
  0x18   :  { %117 = vmatpush.msra.mxu0 %v30_v42  ;;  %176 = vmatpush.msra.mxu3 %v79_v43 }
  0x19   :  { %157 = vmatpush.msra.mxu2 %v62_v44  ;;  %136 = vmatpush.msra.mxu1 %v47_v45 }
  0x1a   :  { %118 = vmatpush.msra.mxu0 %v29_v46  ;;  %177 = vmatpush.msra.mxu3 %v78_v47 }
  0x1b   :  { %158 = vmatpush.msra.mxu2 %v61_v48  ;;  %137 = vmatpush.msra.mxu1 %v46_v49 }
  0x1c   :  { %119 = vmatpush.msra.mxu0 %v28_v50  ;;  %178 = vmatpush.msra.mxu3 %v77_v51 }
  0x1d   :  { %10 = vsyncpa [#allocation3], 0  ;;  %v26_v58 = vld [vmem:[%s618_s1] sm:$0xff]  ;;  %159 = vmatpush.msra.mxu2 %v60_v53  ;;  %138 = vmatpush.msra.mxu1 %v45_v54  ;;  %v75_v59 = vld [vmem:[%s618_s1 + $0x188] sm:$0xff]  ;;  %vm231_vm0 = vcmask 1043456   ;;  %vm102_vm1 = vcmask 523264  }
  0x1e   :  { %120 = vmatpush.msra.mxu0 %v27_v52  ;;  %v97_v60 = vld [vmem:[%s618_s1 + $0x238] sm:$0xff]  ;;  %179 = vmatpush.msra.mxu3 %v76_v55  ;;  %v58_v61 = vld [vmem:[%s618_s1 + $0x100] sm:$0xff]  ;;  %v23_v62 = vld [vmem:[%s617_s0 + $0x10] sm:$0xff]  ;;  %vm227_vm2 = vcmask 818176   ;;  %s264_s27 = sshll.u32 %s622_s5, 4  ;;  %vm255_vm3 = vcmask 80896   ;;  %s265_s27 = int_to_ptr.hbm [resolvable:$true] %s264_s27 }
  0x1f   :  { %160 = vmatpush.msra.mxu2 %v59_v56  ;;  %139 = vmatpush.msra.mxu1 %v44_v57  ;;  %v43_v63 = vld [vmem:[%s618_s1 + $0x88] sm:$0xff]  ;;  %v96_v0 = vld [vmem:[%s618_s1 + $0x230] sm:$0xff]  ;;  %v74_v1 = vld [vmem:[%s618_s1 + $0x180] sm:$0xff] }
  0x20   :  { %121 = vmatpush.msra.mxu0 %v26_v58  ;;  %180 = vmatpush.msra.mxu3 %v75_v59  ;;  %v21_v2 = vld [vmem:[%s617_s0] sm:$0xff]  ;;  %v24_v3 = vld [vmem:[%s617_s0 + $0x18] sm:$0xff]  ;;  %v95_v4 = vld [vmem:[%s618_s1 + $0x228] sm:$0xff] }
  0x21   :  { %161 = vmatpush.msra.mxu2 %v58_v61  ;;  %140 = vmatpush.msra.mxu1 %v43_v63  ;;  %v42_v5 = vld [vmem:[%s618_s1 + $0x80] sm:$0xff]  ;;  %v22_v6 = vld [vmem:[%s617_s0 + $0x8] sm:$0xff]  ;;  %v93_v9 = vld [vmem:[%s618_s1 + $0x218] sm:$0xff] }
  0x22   :  { %194 = vmatpush.msrb.mxu0 %v97_v60  ;;  %162 = vmatmul.f32.vlgmr.msra.gmra.mxu2 %v23_v62  ;;  %v94_v7 = vld [vmem:[%s618_s1 + $0x220] sm:$0xff]  ;;  %v92_v10 = vld [vmem:[%s618_s1 + $0x210] sm:$0xff]  ;;  %v91_v11 = vld [vmem:[%s618_s1 + $0x208] sm:$0xff] }
  0x23   :  { %181 = vmatpush.msra.mxu3 %v74_v1  ;;  %122 = vmatmul.f32.vlgmr.msra.gmra.mxu0 %v21_v2  ;;  %v222_v8 = vld [vmem:[%s620_s3 + $0x60] sm:$0xf]  ;;  %v221_v14 = vld [vmem:[%s620_s3 + $0x58] sm:$0xff]  ;;  %v220_v15 = vld [vmem:[%s620_s3 + $0x50] sm:$0xff] }
  0x24   :  { %195 = vmatpush.msrb.mxu0 %v96_v0  ;;  %182 = vmatmul.f32.vlgmr.msra.gmra.mxu3 %v24_v3  ;;  %v90_v12 = vld [vmem:[%s618_s1 + $0x200] sm:$0xff]  ;;  %v219_v16 = vld [vmem:[%s620_s3 + $0x48] sm:$0xff]  ;;  %v217_v18 = vld [vmem:[%s620_s3 + $0x38] sm:$0xff] }
  0x25   :  { %141 = vmatpush.msra.mxu1 %v42_v5  ;;  %v25_v13 = vld [vmem:[%s617_s0 + $0x20] sm:$0xff]  ;;  %v216_v19 = vld [vmem:[%s620_s3 + $0x30] sm:$0xff]  ;;  %v215_v20 = vld [vmem:[%s620_s3 + $0x28] sm:$0xff] }
  0x26   :  { %196 = vmatpush.msrb.mxu0 %v95_v4  ;;  %142 = vmatmul.f32.vlgmr.msra.gmra.mxu1 %v22_v6  ;;  %v218_v17 = vld [vmem:[%s620_s3 + $0x40] sm:$0xff]  ;;  %v213_v22 = vld [vmem:[%s620_s3 + $0x18] sm:$0xff]  ;;  %v212_v23 = vld [vmem:[%s620_s3 + $0x10] sm:$0xff] }
  0x27   :  { %274 = vmatpush.msk.msrb.mxu1 %vm231_vm0, %v222_v8  ;;  %v214_v21 = vld [vmem:[%s620_s3 + $0x20] sm:$0xff]  ;;  %v211_v24 = vld [vmem:[%s620_s3 + $0x8] sm:$0xff] }
  0x28   :  { %197 = vmatpush.msrb.mxu0 %v94_v7  ;;  %v210_v25 = vld [vmem:[%s620_s3] sm:$0xff] }
  0x29   :  { %239 = vmatpush.msrb.mxu1 %v221_v14  ;;  %v277_v26 = vld [vmem:[%s619_s2] ss:$0 sm:$0xff]  ;;  %s307_s2 = smov [#allocation2]  }
  0x2a   :  { %198 = vmatpush.msrb.mxu0 %v93_v9  ;;  %v278_v41 = vld [vmem:[%s621_s4] ss:$0 sm:$0xff]  ;;  %s262_s24 = sshll.u32 %s307_s2, 4  ;;  %s263_s24 = int_to_ptr.vmem [resolvable:$true] %s262_s24 }
  0x2b   :  { %240 = vmatpush.msrb.mxu1 %v220_v15 }
  0x2c   :  { %199 = vmatpush.msrb.mxu0 %v92_v10 }
  0x2d   :  { %241 = vmatpush.msrb.mxu1 %v219_v16 }
  0x2e   :  { %200 = vmatpush.msrb.mxu0 %v91_v11 }
  0x2f   :  { %242 = vmatpush.msrb.mxu1 %v218_v17 }
  0x30   :  { %201 = vmatpush.msrb.mxu0 %v90_v12 }
  0x31   :  { %273 = vmatmul.msk.f32.vlgmr.msrb.gmra.mxu0 %vm102_vm1, %v25_v13  ;;  %243 = vmatpush.msrb.mxu1 %v217_v18 }
  0x33   :  { %244 = vmatpush.msrb.mxu1 %v216_v19 }
  0x35   :  { %245 = vmatpush.msrb.mxu1 %v215_v20 }
  0x37   :  { %246 = vmatpush.msrb.mxu1 %v214_v21 }
  0x39   :  { %247 = vmatpush.msrb.mxu1 %v213_v22 }
  0x3b   :  { %248 = vmatpush.msrb.mxu1 %v212_v23 }
  0x3d   :  { %249 = vmatpush.msrb.mxu1 %v211_v24 }
  0x3f   :  { %250 = vmatpush.msrb.mxu1 %v210_v25 }
  0xa0   :  { %v123_v27 = vpop.f32.mrf.mxu0 }
  0xa1   :  { %v124_v28 = vadd.f32 %v277_v26, %v123_v27 }
  0xa3   :  { %v143_v29 = vpop.f32.mrf.mxu1 }
  0xa4   :  { %v144_v30 = vadd.f32 %v143_v29, %v124_v28 }
  0xa5   :  { %v163_v31 = vpop.f32.mrf.mxu2 }
  0xa6   :  { %v164_v32 = vadd.f32 %v163_v31, %v144_v30 }
  0xa7   :  { %v183_v33 = vpop.f32.mrf.mxu3 }
  0xa8   :  { %v184_v34 = vadd.f32 %v183_v33, %v164_v32 }
  0xae   :  { %v203_v35 = vpop.f32.mrf.mxu0 }
  0xaf   :  { %v204_v36 = vadd.f32 %v203_v35, %v184_v34 }
  0xb1   :  { %v206_v37 = vmul.f32 0.5, %v204_v36 }
  0xb3   :  { %279 = vtanh.f32 %v206_v37 }
  0xb9   :  { %v280_v38 = vpop.eup %279 }
  0xba   :  { %v208_v39 = vadd.f32 1.0, %v280_v38 }
  0xbc   :  { %v209_v40 = vmul.f32 0.5, %v208_v39 }
  0xbe   :  { %275 = vmatmul.msk.f32.vlgmr.msrb.gmra.mxu1 %vm227_vm2, %v209_v40 }
 0x13b   :  { %v252_v42 = vpop.f32.mrf.mxu1 }
 0x13c   :  { %v253_v43 = vadd.f32 %v278_v41, %v252_v42 }
 0x13e   :  { %256 = vst.msk [vmem:[#allocation2] sm:$0xff] %vm255_vm3, %v253_v43 }
 0x13f   :  { %267 = dma.vmem_to_hbm [thread:$0]  %s263_s24, 128, %s265_s27, [#allocation3]  }
 0x140   :  { %305 = dma.done.wait [#allocation3], 128  }
 0x141   :  { %306 = vsyncadd [#allocation3], 4294967168 }
 0x142   :  { %272 = vsyncpa [#allocation3], 1 }

</bundles_post_ra>
